<compile_context>
chip_gen: v6e
topology: v6e:2x2x1
jax: 0.10.0
libtpu: 0.0.40
codegen_flags: <defaults>
</compile_context>

<pallas_src>
import functools

import jax
import jax.numpy as jnp
from jax import lax
from jax.experimental import pallas as pl
from jax.experimental.pallas import tpu as pltpu


# ---------------------------------------------------------------------------
# Parameter construction (plain-JAX glue; mirrors GDN.__init__ + handle()).
# ---------------------------------------------------------------------------
_REPARAM_OFFSET = 2.0 ** (-18)
_PEDESTAL = _REPARAM_OFFSET ** 2


def _nonneg_init(x):
    # NonNegativeParametrizer.init: sqrt(max(x + pedestal, pedestal))
    return jnp.sqrt(jnp.maximum(x + _PEDESTAL, _PEDESTAL))


def _nonneg_forward(x, minimum=0.0):
    # NonNegativeParametrizer.forward: lower_bound(x)**2 - pedestal
    bound = (minimum + _PEDESTAL) ** 0.5
    out = jnp.maximum(x, bound)
    return out * out - _PEDESTAL


def make_gdn_params(in_channels, beta_min=1e-6, gamma_init=0.1,
                    dtype=jnp.float32):
    """Deterministic parameter init, identical to GDN.__init__ + handle()."""
    beta = _nonneg_init(jnp.ones((in_channels,), dtype=dtype))
    gamma = _nonneg_init(gamma_init * jnp.eye(in_channels, dtype=dtype))
    beta2 = _nonneg_forward(beta, minimum=beta_min)          # (C,)
    gamma2 = _nonneg_forward(gamma, minimum=0.0)             # (C, C)
    return gamma2.astype(dtype), beta2.astype(dtype)


# ---------------------------------------------------------------------------
# Kernel: fused square -> channel contraction -> (r)sqrt -> multiply.
# Block layout is (bN, C, tile_hw): channels on sublanes, spatial on lanes.
# ---------------------------------------------------------------------------
def _gdn_kernel(x_ref, gamma_ref, beta_ref, o_ref, *, inverse, use_bf16_mxu):
    bn, C, _ = x_ref.shape
    gamma = gamma_ref[...]                                   # (C, C), loaded once
    beta = beta_ref[...].astype(jnp.float32)                 # (C, 1)
    use_vpu = (C <= 8) and not use_bf16_mxu

    for b in range(bn):                                      # static unroll (bn <= 8)
        x = x_ref[b].astype(jnp.float32)                     # (C, T)
        x2 = x * x
        if use_vpu:
            # Tiny C: unrolled VPU FMA over channels; skips the MXU entirely
            # (removes MXU result-pop latency from the per-step epilogue).
            g = gamma.astype(jnp.float32)
            norm = g[:, 0:1] * x2[0:1, :]
            for ci in range(1, C):
                norm = norm + g[:, ci:ci + 1] * x2[ci:ci + 1, :]
            norm = norm + beta
        else:
            if use_bf16_mxu:
                lhs = gamma.astype(jnp.bfloat16)
                rhs = x2.astype(jnp.bfloat16)
            else:
                lhs = gamma.astype(jnp.float32)
                rhs = x2
            # norm[o, p] = sum_c gamma2[o, c] * x2[c, p] + beta2[o]
            norm = jnp.dot(lhs, rhs, preferred_element_type=jnp.float32) + beta
        norm = jnp.sqrt(norm) if inverse else lax.rsqrt(norm)   # EUP op
        o_ref[b] = (x * norm).astype(o_ref.dtype)


# ---------------------------------------------------------------------------
# Tile planning: size blocks by a per-generation VMEM byte budget.
# ---------------------------------------------------------------------------
_MAX_BUFFER_BYTES = 8 * 1024 * 1024      # per pipelined tile, upper cap


def _round_down_128(v):
    return (v // 128) * 128


def _vmem_plan():
    """Per-buffer byte target and scoped-VMEM limit for this TPU generation."""
    try:
        cap = int(pltpu.get_tpu_info().vmem_capacity_bytes)
    except Exception:
        cap = 64 * 1024 * 1024           # conservative fallback (v7x-sized VMEM)
    # ~60% of VMEM split across ~8 tile-equivalents: 2x double-buffered in/out
    # tiles plus a few f32 compiler intermediates (x^2, norm).  Caps at 8 MiB
    # per buffer -- already >> the ~1 MiB needed to hit ~85% of HBM roofline.
    per_buffer = min(_MAX_BUFFER_BYTES, (cap * 6 // 10) // 8)
    vmem_limit = int(min(cap * 85 // 100, 100 * 1024 * 1024))
    return per_buffer, vmem_limit


def _pick_blocks(N, C, HW, itemsize, per_buffer_bytes):
    """Pick (bn, tile_hw) so one pipelined buffer is ~per_buffer_bytes."""
    row_bytes = C * itemsize                 # bytes per spatial position
    img_bytes = row_bytes * HW               # bytes per image
    if img_bytes >= per_buffer_bytes:
        # Large feature map: one image per step, tile the spatial axis.
        bn = 1
        tile = _round_down_128(per_buffer_bytes // row_bytes)
        tile = min(HW, max(128, tile))
    else:
        # Small feature map: whole image(s) per step, pack batch elements.
        tile = HW
        bn = int(min(max(1, per_buffer_bytes // img_bytes), N, 8))
    # Keep >= 2 grid steps when possible so both v7x TensorCores get work.
    if pl.cdiv(N, bn) * pl.cdiv(HW, tile) < 2:
        if N >= 2:
            bn = -(-N // 2)                                  # ceil(N/2)
        elif tile == HW and HW >= 256:
            tile = max(128, _round_down_128(-(-HW // 2)))    # ~HW/2, 128-aligned
    return int(bn), int(tile)


# ---------------------------------------------------------------------------
# Wrapper
# ---------------------------------------------------------------------------
def gdn_forward(x_nchw, gamma2, beta2, *, inverse=False,
                max_buffer_bytes=None, mxu_bf16=None):
    """Full GDN forward on an NCHW input (matching the PyTorch module)."""
    N, C, H, W = x_nchw.shape
    HW = H * W
    itemsize = jnp.dtype(x_nchw.dtype).itemsize

    per_buffer, vmem_limit = _vmem_plan()
    if max_buffer_bytes is not None:
        per_buffer = int(max_buffer_bytes)
    bn, tile = _pick_blocks(N, C, HW, itemsize, per_buffer)

    if mxu_bf16 is None:
        # bf16 activations, or very large C (keeps v5e memory-bound), use bf16
        # MXU operands with an f32 accumulator.
        mxu_bf16 = (jnp.dtype(x_nchw.dtype) == jnp.bfloat16) or (C >= 256)

    x_r = x_nchw.reshape(N, C, HW)            # free view, no data movement
    beta_col = beta2.reshape(C, 1)
    param_itemsize = jnp.dtype(gamma2.dtype).itemsize

    grid = (pl.cdiv(N, bn), pl.cdiv(HW, tile))
    kernel = functools.partial(_gdn_kernel, inverse=inverse,
                               use_bf16_mxu=bool(mxu_bf16))

    out = pl.pallas_call(
        kernel,
        out_shape=jax.ShapeDtypeStruct((N, C, HW), x_nchw.dtype),
        grid_spec=pltpu.PrefetchScalarGridSpec(
            num_scalar_prefetch=0,
            grid=grid,
            in_specs=[
                pl.BlockSpec((bn, C, tile), lambda i, j: (i, 0, j)),   # x tile
                pl.BlockSpec((C, C), lambda i, j: (0, 0)),             # gamma2
                pl.BlockSpec((C, 1), lambda i, j: (0, 0)),             # beta2
            ],
            out_specs=pl.BlockSpec((bn, C, tile), lambda i, j: (i, 0, j)),
        ),
        compiler_params=pltpu.CompilerParams(
            dimension_semantics=("parallel", "parallel"),
            vmem_limit_bytes=vmem_limit),
        cost_estimate=pl.CostEstimate(
            flops=2 * N * HW * C * C + 3 * N * HW * C,
            transcendentals=N * HW * C,
            bytes_accessed=2 * N * C * HW * itemsize
                           + (C * C + C) * param_itemsize),
    )(x_r, gamma2, beta_col)
    return out.reshape(N, C, H, W)


# ---------------------------------------------------------------------------
# Reference in plain JAX (for verification)
# ---------------------------------------------------------------------------
def gdn_reference(x_nchw, gamma2, beta2, *, inverse=False):
    norm = jnp.einsum('nchw,oc->nohw', x_nchw * x_nchw, gamma2)
    norm = norm + beta2[None, :, None, None]
    norm = jnp.sqrt(norm) if inverse else lax.rsqrt(norm)
    return x_nchw * norm


if __name__ == "__main__":
    key = jax.random.PRNGKey(0)
    ok = True

    # Small shapes consistent with the module's GDN usage (NCHW, float32).
    # (shape, forced per-buffer bytes or None for the auto VMEM plan)
    cases = [
        ((2, 4, 16, 16), None),            # tiny-C VPU path, batch-axis grid
        ((4, 4, 16, 16), None),            # batch packing (2 images per step)
        ((1, 8, 12, 12), None),            # non-128-multiple spatial, 1 block
        ((1, 32, 16, 16), None),           # MXU path, 2 spatial blocks (v7x split)
        ((1, 16, 8, 40), 16 * 4 * 128),    # forced small tile -> partial masked block
    ]
    for shape, max_buf in cases:
        N, C, H, W = shape
        key, sub = jax.random.split(key)
        x = jax.random.normal(sub, (N, C, H, W), dtype=jnp.float32)
        gamma2, beta2 = make_gdn_params(C)

        # Decoder uses GDN(..., inverse=True); check both modes vs reference.
        for inverse in (True, False):
            out = gdn_forward(x, gamma2, beta2, inverse=inverse,
                              max_buffer_bytes=max_buf)
            out = jax.block_until_ready(out)
            ref = gdn_reference(x, gamma2, beta2, inverse=inverse)
            ok &= bool(jnp.allclose(out, ref, atol=1e-5, rtol=1e-5))

    print("KERNEL_OK" if ok else "MISMATCH")
</pallas_src>

<mosaic_0001>
module attributes {stable_mosaic.version = 11 : i64} {
  func.func @_gdn_kernel(%arg0: i32, %arg1: i32, %arg2: memref<1x4x256xf32, #tpu.memory_space<vmem>>, %arg3: memref<4x4xf32, #tpu.memory_space<vmem>>, %arg4: memref<4x1xf32, #tpu.memory_space<vmem>>, %arg5: memref<1x4x256xf32, #tpu.memory_space<vmem>>) attributes {dimension_semantics = [#tpu.dimension_semantics<parallel>, #tpu.dimension_semantics<parallel>], iteration_bounds = array<i64: 2, 1>, scalar_prefetch = 0 : i64, scratch_operands = 0 : i64, tpu.core_type = #tpu.core_type<tc>, window_params = [{transform_indices = @transform_0, window_bounds = array<i64: 1, 4, 256>}, {pipeline_mode = #tpu.pipeline_mode<synchronous>, transform_indices = @transform_1, window_bounds = array<i64: 4, 4>}, {pipeline_mode = #tpu.pipeline_mode<synchronous>, transform_indices = @transform_2, window_bounds = array<i64: 4, 1>}, {transform_indices = @transform_3, window_bounds = array<i64: 1, 4, 256>}]} {
    %c0 = arith.constant 0 : index
    %c0_0 = arith.constant 0 : index
    %0 = vector.load %arg3[%c0, %c0_0] : memref<4x4xf32, #tpu.memory_space<vmem>>, vector<4x4xf32>
    %c0_1 = arith.constant 0 : index
    %c0_2 = arith.constant 0 : index
    %1 = vector.load %arg4[%c0_1, %c0_2] : memref<4x1xf32, #tpu.memory_space<vmem>>, vector<4x1xf32>
    %c0_3 = arith.constant 0 : index
    %c0_4 = arith.constant 0 : index
    %c0_5 = arith.constant 0 : index
    %2 = vector.load %arg2[%c0_3, %c0_4, %c0_5] : memref<1x4x256xf32, #tpu.memory_space<vmem>>, vector<1x4x256xf32>
    %3 = vector.shape_cast %2 : vector<1x4x256xf32> to vector<4x256xf32>
    %4 = arith.mulf %3, %3 : vector<4x256xf32>
    %5 = vector.extract_strided_slice %0 {offsets = [0, 0], sizes = [4, 1], strides = [1, 1]} : vector<4x4xf32> to vector<4x1xf32>
    %6 = vector.extract_strided_slice %4 {offsets = [0, 0], sizes = [1, 256], strides = [1, 1]} : vector<4x256xf32> to vector<1x256xf32>
    %7 = vector.broadcast %5 : vector<4x1xf32> to vector<4x256xf32>
    %8 = vector.broadcast %6 : vector<1x256xf32> to vector<4x256xf32>
    %9 = arith.mulf %7, %8 : vector<4x256xf32>
    %10 = vector.extract_strided_slice %0 {offsets = [0, 1], sizes = [4, 1], strides = [1, 1]} : vector<4x4xf32> to vector<4x1xf32>
    %11 = vector.extract_strided_slice %4 {offsets = [1, 0], sizes = [1, 256], strides = [1, 1]} : vector<4x256xf32> to vector<1x256xf32>
    %12 = vector.broadcast %10 : vector<4x1xf32> to vector<4x256xf32>
    %13 = vector.broadcast %11 : vector<1x256xf32> to vector<4x256xf32>
    %14 = arith.mulf %12, %13 : vector<4x256xf32>
    %15 = arith.addf %9, %14 : vector<4x256xf32>
    %16 = vector.extract_strided_slice %0 {offsets = [0, 2], sizes = [4, 1], strides = [1, 1]} : vector<4x4xf32> to vector<4x1xf32>
    %17 = vector.extract_strided_slice %4 {offsets = [2, 0], sizes = [1, 256], strides = [1, 1]} : vector<4x256xf32> to vector<1x256xf32>
    %18 = vector.broadcast %16 : vector<4x1xf32> to vector<4x256xf32>
    %19 = vector.broadcast %17 : vector<1x256xf32> to vector<4x256xf32>
    %20 = arith.mulf %18, %19 : vector<4x256xf32>
    %21 = arith.addf %15, %20 : vector<4x256xf32>
    %22 = vector.extract_strided_slice %0 {offsets = [0, 3], sizes = [4, 1], strides = [1, 1]} : vector<4x4xf32> to vector<4x1xf32>
    %23 = vector.extract_strided_slice %4 {offsets = [3, 0], sizes = [1, 256], strides = [1, 1]} : vector<4x256xf32> to vector<1x256xf32>
    %24 = vector.broadcast %22 : vector<4x1xf32> to vector<4x256xf32>
    %25 = vector.broadcast %23 : vector<1x256xf32> to vector<4x256xf32>
    %26 = arith.mulf %24, %25 : vector<4x256xf32>
    %27 = arith.addf %21, %26 : vector<4x256xf32>
    %28 = vector.broadcast %1 : vector<4x1xf32> to vector<4x256xf32>
    %29 = arith.addf %27, %28 : vector<4x256xf32>
    %30 = math.sqrt %29 : vector<4x256xf32>
    %31 = arith.mulf %3, %30 : vector<4x256xf32>
    %c0_6 = arith.constant 0 : index
    %c0_7 = arith.constant 0 : index
    %c0_8 = arith.constant 0 : index
    %32 = vector.load %arg5[%c0_6, %c0_7, %c0_8] : memref<1x4x256xf32, #tpu.memory_space<vmem>>, vector<1x4x256xf32>
    %33 = vector.shape_cast %32 : vector<1x4x256xf32> to vector<4x256xf32>
    %34 = vector.shape_cast %31 : vector<4x256xf32> to vector<1x4x256xf32>
    tpu.vector_store %arg5[%c0_6, %c0_7, %c0_8], %34 {strides = array<i32>} : memref<1x4x256xf32, #tpu.memory_space<vmem>>, vector<1x4x256xf32>,
    return
  }
  func.func @transform_0(%arg0: i32, %arg1: i32) -> (i32, i32, i32) {
    %c0_i32 = arith.constant 0 : i32
    %c0_i32_0 = arith.constant 0 : i32
    return %arg0, %c0_i32, %arg1 : i32, i32, i32
  }
  func.func @transform_1(%arg0: i32, %arg1: i32) -> (i32, i32) {
    %c0_i32 = arith.constant 0 : i32
    %c0_i32_0 = arith.constant 0 : i32
    %c0_i32_1 = arith.constant 0 : i32
    return %c0_i32, %c0_i32_0 : i32, i32
  }
  func.func @transform_2(%arg0: i32, %arg1: i32) -> (i32, i32) {
    %c0_i32 = arith.constant 0 : i32
    %c0_i32_0 = arith.constant 0 : i32
    %c0_i32_1 = arith.constant 0 : i32
    return %c0_i32, %c0_i32_0 : i32, i32
  }
  func.func @transform_3(%arg0: i32, %arg1: i32) -> (i32, i32, i32) {
    %c0_i32 = arith.constant 0 : i32
    %c0_i32_0 = arith.constant 0 : i32
    return %arg0, %c0_i32, %arg1 : i32, i32, i32
  }
}

</mosaic_0001>

<bundles_post_ra>
// kernel: tpu_custom_call.1
= control target key start
LH: loop header
LB: loop body
LE: loop exit
PB: predicated region body
PF: predicated region fallthrough
CT: control target
= control target key end

     0   :  { %8 = vsyncpa [#allocation3], 0  ;;  %s821_s0 = inlined_call_operand.hbm [shape: f32[2,4,256], index: 0, kind: input, shape index: {}]   ;;  %s822_s1 = inlined_call_operand.vmem [shape: f32[4,4], index: 1, kind: input, shape index: {}]   ;;  %s823_s2 = inlined_call_operand.vmem [shape: f32[4,1], index: 2, kind: input, shape index: {}]   ;;  %s824_s3 = inlined_call_operand.hbm [shape: f32[2,4,256], index: 3, kind: output, shape index: {}]  }
   0x1   :  { %10 = vsyncpa [#allocation3 + $0x1], 0 }
   0x2   :  { %11 = vsyncpa [#allocation4], 0 }
   0x3   :  { %13 = vsyncpa [#allocation4 + $0x1], 0  ;;  %s672_s12 = smov 0   ;;  %s674_s13 = smov 0  }
   0x4   :  { %s676_s14 = smov 0   ;;  %s678_s15 = smov 0  }
   0x5   :  { %s680_s16 = smov 0   ;;  %s682_s17 = smov 0  }
   0x6 LB: > { %s443_s18 = sadd.s32 4294967295, %s644_s17   ;;  %s444_s19 = sadd.s32 4294967294, %s644_s17   ;;  %s644_s17 = sphi %s682_s17, %s19_s17   ;;  %s640_s16 = sphi %s680_s16, %s836_s16   ;;  %s636_s15 = sphi %s678_s15, %s835_s15   ;;  %s632_s14 = sphi %s676_s14, %s834_s14   ;;  %s628_s13 = sphi %s674_s13, %s833_s13   ;;  %s624_s12 = sphi %s672_s12, %s832_s12  }
   0x7   : > { %s31_s20 = sadd.s32 1, %s640_s16  ;;  %s40_s21 = sadd.s32 1, %s632_s14 }
   0x8   : > { %p33_p0 = scmp.ge.s32.totalorder %s31_s20, 2  ;;  %p47_p1 = scmp.ne.s32.totalorder %s632_s14, %s628_s13 }
   0x9   : > { %p48_p2 = scmp.eq.s32.totalorder %s644_s17, 0  ;;  %p53_p3 = scmp.ne.s32.totalorder %s628_s13, %s624_s12 }
   0xa   : > { %s838_s20 = smov (%p33_p0, %s31_s20), 0  ;;  %p54_p5 = scmp.eq.s32.totalorder %s443_s18, 0 }
   0xb   : > { %p713_p4 = por %p48_p2, %p47_p1  ;;  %s35_s23 = ssub.s32 %s640_s16, %s838_s20 }
   0xc   : > { %p121_p6 = scmp.eq.s32.totalorder %s443_s18, 1  ;;  %p38_p7 = scmp.eq.s32.totalorder %s35_s23, 0 }
   0xd   : > { %p719_p8 = por %p54_p5, %p53_p3  ;;  %p127_p10 = scmp.eq.s32.totalorder %s444_s19, 1 }
   0xe   : > { %p723_p9 = por %p121_p6, %p47_p1  ;;  %p472_p13 = scmp.lt.s32.totalorder %s644_s17, 2 }
   0xf   : > { %s728_s26 = scalar_select %p38_p7, %s632_s14, %s40_s21  }
  0x10   : > { %p730_p11 = por %p127_p10, %p53_p3  ;;  %s153_s28 = sand.u32 1, %s632_s14  }
  0x11   : > { %s447_s29 = sshll.u32 %s153_s28, 3  ;;  %s458_s30 = sshll.u32 %s640_s16, 7 }
  0x12   : > { %s828_s27 = scalar_select %p730_p11, 1, 0 }
  0x13   : > { %s165_s6 = scalar_lea.hbm %s821_s0, %s458_s30  ;;  %s157_s7 = scalar_lea.vmem [#allocation2], %s447_s29 }
  0x14   : > { %s167_s8 = sshll.u32 %s157_s7, 4  ;;  %p743_p0 = pnand %p472_p13, %p713_p4  ;;  %s168_s8 = int_to_ptr.vmem [resolvable:$true] %s167_s8 }
  0x15   : > { %p450_p1 = scmp.ge.s32.totalorder %s644_s17, 1  ;;  %p172_p2 = scmp.lt.s32.totalorder %s644_s17, 3 }
  0x16   : > { %s154_s10 = scalar_lea.sflag [#allocation3], %s153_s28  ;;  %p538_p3 = pneg %p743_p0 }
  0x17   : > { %s549_s11 = scalar_lea.vmem %s168_s8, 128  ;;  %s646_s18 = smov [#allocation2]  }
  0x18   : > { %p550_p5 = scmp.ne.s32.totalorder %s168_s8, %s549_s11  ;;  %s554_s19 = sshll.u32 %s646_s18, 4  ;;  %s555_s19 = int_to_ptr.vmem [resolvable:$false] %s554_s19 }
  0x19   : > { %s556_s21 = scalar_lea.vmem %s555_s19, 256  ;;  %p557_p10 = scmp.lt.s32.totalorder %s168_s8, %s555_s19 }
  0x1a   : > { %p552_p6 = pnand %p550_p5, %p538_p3  ;;  %p558_p12 = scmp.lt.s32.totalorder %s556_s21, %s549_s11 }
  0x1c   : > { %p553_p7 = pneg %p552_p6  ;;  %p559_p4 = por %p558_p12, %p557_p10 }
  0x1e   : > { %p560_p13 = pnand %p559_p4, %p553_p7 }
  0x20   : > { %563 = shalt.err (!%p560_p13)
}
  0x21   : > { %467 = dma.hbm_to_vmem [thread:$0]  (!%p743_p0), %s165_s6, 128, %s168_s8, %s154_s10  }
  0x22   : > { %p173_p11 = pnand %p450_p1, %p172_p2 }
  0x23   : > { %s758_s22 = sand.u32 (!%p173_p11), 1, %s628_s13  }
  0x24   : > { %176 = sbr.rel (%p173_p11) target bundleno = 219 (0xdb), region = 32  ;;  %s451_s23 = sshll.u32 (!%p173_p11), %s758_s22, 3 }
  0x25   : > { %s179_s28 = scalar_lea.sflag (!%p173_p11), [#allocation3], %s758_s22  ;;  %s182_s29 = scalar_lea.vmem (!%p173_p11), [#allocation2], %s451_s23 }
  0x29   : > { %615 = dma.done.wait (%p719_p8), %s179_s28, 128  }
  0x2a   : > { %617 = vsyncadd (%p719_p8), %s179_s28, 4294967168  ;;  %v647_v0 = vmov 0   ;;  %v648_v1 = vmov 2   ;;  %v207_v2 = vld [vmem:[%s822_s1] sm:$0xf]  ;;  %v649_v3 = vmov 1   ;;  %v217_v6 = vlaneseq }
  0x2b   : > { %526 = vset.pattern.permute.xlu0 %v647_v0  ;;  %528 = vset.pattern.permute.xlu1 %v648_v1  ;;  %v650_v4 = vmov 3   ;;  %v208_v5 = vld [vmem:[%s823_s2] sm:$0xf]  ;;  %s459_s24 = sshll.u32 %s636_s15, 7  ;;  %s204_s7 = scalar_lea.vmem [#allocation5], %s451_s23 }
  0x2c   : > { %213 = vperm.xlu0 %526, %v207_v2   ;;  %264 = vperm.xlu1 %528, %v207_v2   ;;  %v218_v7 = vshrl.u32 %v217_v6, 7  ;;  %v774_v8 = vld [vmem:[%s182_s29] sm:$0xff]  ;;  %s359_s8 = sshll.u32 %s204_s7, 4  ;;  %s357_s11 = scalar_lea.hbm %s824_s3, %s459_s24  ;;  %s360_s8 = int_to_ptr.vmem [resolvable:$true] %s359_s8 }
  0x2d   : > { %v210_v10 = vmul.f32 %v774_v8, %v774_v8  ;;  %s343_s18 = scalar_lea.sflag [#allocation4], %s758_s22  ;;  %s564_s19 = scalar_lea.vmem %s360_s8, 128 }
  0x2e   : > { %v219_v9 = vsub.s32 0, %v218_v7  ;;  %v223_v11 = vsub.s32 4, %v218_v7  ;;  %v243_v12 = vsub.s32 1, %v218_v7  ;;  %v247_v13 = vsub.s32 5, %v218_v7  ;;  %p565_p8 = scmp.ne.s32.totalorder %s360_s8, %s564_s19  ;;  %s651_s21 = smov [#allocation5]  }
  0x2f   : > { %v269_v14 = vsub.s32 2, %v218_v7  ;;  %v273_v15 = vsub.s32 6, %v218_v7  ;;  %v295_v16 = vsub.s32 3, %v218_v7  ;;  %v299_v17 = vsub.s32 7, %v218_v7  ;;  %s568_s15 = sshll.u32 %s651_s21, 4  ;;  %s569_s15 = int_to_ptr.vmem [resolvable:$false] %s568_s15 }
  0x30   : > { %527 = vset.pattern.permute.xlu0 %v649_v3  ;;  %529 = vset.pattern.permute.xlu1 %v650_v4  ;;  %v220_v18 = vrot.slane %v210_v10, %v219_v9  ;;  %v224_v19 = vrot.slane %v210_v10, %v223_v11  ;;  %v244_v20 = vrot.slane %v210_v10, %v243_v12  ;;  %p566_p11 = pnand %p565_p8, %p723_p9  ;;  %s570_s23 = scalar_lea.vmem %s569_s15, 256 }
  0x31   : > { %238 = vperm.xlu0 %527, %v207_v2   ;;  %290 = vperm.xlu1 %529, %v207_v2   ;;  %v248_v21 = vrot.slane %v210_v10, %v247_v13  ;;  %v270_v22 = vrot.slane %v210_v10, %v269_v14  ;;  %v274_v23 = vrot.slane %v210_v10, %v273_v15  ;;  %p571_p0 = scmp.lt.s32.totalorder %s360_s8, %s569_s15  ;;  %p572_p1 = scmp.lt.s32.totalorder %s570_s23, %s564_s19 }
  0x32   : > { %v296_v26 = vrot.slane %v210_v10, %v295_v16  ;;  %v300_v27 = vrot.slane %v210_v10, %v299_v17  ;;  %v230_v28 = vrot.slane %v220_v18, %v219_v9  ;;  %v234_v29 = vrot.slane %v224_v19, %v219_v9  ;;  %p567_p12 = pneg %p566_p11 }
  0x33   : > { %v254_v30 = vrot.slane %v244_v20, %v243_v12  ;;  %v258_v31 = vrot.slane %v248_v21, %v243_v12  ;;  %v280_v32 = vrot.slane %v270_v22, %v269_v14  ;;  %v284_v33 = vrot.slane %v274_v23, %v269_v14  ;;  %p573_p2 = por %p572_p1, %p571_p0 }
  0x34   : > { %v306_v34 = vrot.slane %v296_v26, %v295_v16  ;;  %v310_v35 = vrot.slane %v300_v27, %v295_v16 }
  0x35   : > { %530 = vset.pattern.permute.xlu1 %v647_v0  ;;  %531 = vset.pattern.permute.xlu0 %v647_v0  ;;  %p574_p3 = pnand %p573_p2, %p567_p12 }
  0x36   : > { %317 = vperm.xlu1 %530, %v208_v5  }
  0xa7   : > { %v214_v24 = vpop.permute.xlu0 %213  ;;  %v265_v25 = vpop.permute.xlu1 %264 }
  0xa8   : > { %v235_v38 = vmul.f32 %v230_v28, %v214_v24  ;;  %v236_v39 = vmul.f32 %v234_v29, %v214_v24  ;;  %v285_v42 = vmul.f32 %v280_v32, %v265_v25  ;;  %v286_v43 = vmul.f32 %v284_v33, %v265_v25 }
  0xac   : > { %v239_v36 = vpop.permute.xlu0 %238  ;;  %v291_v37 = vpop.permute.xlu1 %290 }
  0xad   : > { %v259_v40 = vmul.f32 %v254_v30, %v239_v36  ;;  %v260_v41 = vmul.f32 %v258_v31, %v239_v36  ;;  %v311_v46 = vmul.f32 %v306_v34, %v291_v37  ;;  %v312_v47 = vmul.f32 %v310_v35, %v291_v37 }
  0xaf   : > { %v261_v44 = vadd.f32 %v259_v40, %v235_v38  ;;  %v262_v45 = vadd.f32 %v260_v41, %v236_v39 }
  0xb1   : > { %v287_v48 = vadd.f32 %v285_v42, %v261_v44  ;;  %v288_v49 = vadd.f32 %v286_v43, %v262_v45  ;;  %v318_v50 = vpop.permute.xlu1 %317 }
  0xb3   : > { %v313_v51 = vadd.f32 %v311_v46, %v287_v48  ;;  %v314_v52 = vadd.f32 %v312_v47, %v288_v49 }
  0xb5   : > { %v320_v53 = vadd.f32 %v318_v50, %v313_v51  ;;  %v321_v54 = vadd.f32 %v318_v50, %v314_v52 }
  0xb7   : > { %532 = vrsqrt.f32 %v320_v53  ;;  %vm324_vm0 = vcmp.eq.f32.partialorder %v320_v53, inf  ;;  %v327_v59 = vand.u32 2147483648, %v320_v53  ;;  %vm326_vm1 = vcmp.eq.f32.partialorder %v320_v53, 0.0 }
  0xb8   : > { %534 = vrsqrt.f32 %v321_v54  ;;  %vm331_vm2 = vcmp.eq.f32.partialorder %v321_v54, inf  ;;  %v334_v61 = vand.u32 2147483648, %v321_v54  ;;  %vm333_vm3 = vcmp.eq.f32.partialorder %v321_v54, 0.0 }
  0xc4   : > { %v533_v55 = vpop.eup %532 }
  0xc5   : > { %v535_v56 = vpop.eup %534  ;;  %v323_v57 = vmul.f32 %v533_v55, %v320_v53 }
  0xc6   : > { %v330_v58 = vmul.f32 %v535_v56, %v321_v54 }
  0xc7   : > { %v325_v60 = vsel %vm324_vm0, %v320_v53, %v323_v57 }
  0xc8   : > { %v328_v62 = vsel %vm326_vm1, %v327_v59, %v325_v60  ;;  %v332_v63 = vsel %vm331_vm2, %v321_v54, %v330_v58 }
  0xc9   : > { %v335_v0 = vsel %vm333_vm3, %v334_v61, %v332_v63 }
  0xca   : > { %v338_v1 = vcombine.low %v328_v62, %v335_v0 }
  0xcc   : > { %v340_v2 = vmul.f32 %v338_v1, %v774_v8 }
  0xce   : > { %341 = vst [vmem:[%s204_s7] sm:$0xff] %v340_v2 }
  0xcf   : > { %577 = shalt.err (!%p574_p3)
}
  0xd0   : > { %s578_s28 = scalar_lea.hbm %s357_s11, 128  ;;  %s582_s30 = scalar_lea.hbm %s824_s3, 256 }
  0xd1   : > { %p579_p5 = scmp.ne.s32.totalorder %s357_s11, %s578_s28  ;;  %p583_p10 = scmp.lt.s32.totalorder %s357_s11, %s824_s3 }
  0xd2   : > { %p584_p4 = scmp.lt.s32.totalorder %s582_s30, %s578_s28 }
  0xd3   : > { %p580_p6 = pnand %p579_p5, %p723_p9 }
  0xd4   : > { %p585_p13 = por %p584_p4, %p583_p10 }
  0xd5   : > { %p581_p7 = pneg %p580_p6 }
  0xd7   : > { %p586_p8 = pnand %p585_p13, %p581_p7 }
  0xd9   : > { %589 = shalt.err (!%p586_p8)
}
  0xda   : > { %462 = dma.vmem_to_hbm [thread:$0]  (%p723_p9), %s360_s8, 128, %s357_s11, %s343_s18  }
  0xdb PF: > { %s371_s6 = sand.u32 1, %s624_s12   ;;  %p830_p11 = scmp.ne.s32.totalorder %s828_s27, 0 }
  0xdc   : > { %p831_p12 = scmp.ge.s32.totalorder %s644_s17, 2  ;;  %s372_s24 = scalar_lea.sflag [#allocation4], %s371_s6 }
  0xde   : > { %p469_p0 = pnand %p831_p12, %p830_p11 }
  0xe0   : > { %p470_p1 = pneg %p469_p0 }
  0xe2   : > { %619 = dma.done.wait (%p470_p1), %s372_s24, 128  }
  0xe3   : > { %621 = vsyncadd (%p470_p1), %s372_s24, 4294967168  ;;  %s19_s17 = sadd.s32 1, %s644_s17   ;;  %s832_s12 = smov %s628_s13 }
  0xe4   : > { %p16_p2 = scmp.ge.s32.totalorder %s19_s17, 4   ;;  %s833_s13 = smov %s632_s14 }
  0xe5   : > { %s834_s14 = smov %s728_s26  ;;  %s835_s15 = smov %s640_s16 }
  0xe6   : > { %s836_s16 = smov %s838_s20  ;;  %18 = sbr.rel (!%p16_p2) target bundleno = 6 (0x6), region = 77 }
  0xeb   :  { %377 = vsyncpa [#allocation3], 1 }
  0xec   :  { %379 = vsyncpa [#allocation3 + $0x1], 1 }
  0xed   :  { %380 = vsyncpa [#allocation4], 1 }
  0xee   :  { %382 = vsyncpa [#allocation4 + $0x1], 1 }

</bundles_post_ra>
